<compile_context>
chip_gen: v5e
topology: v5e:2x2
jax: 0.10.0
libtpu: 0.0.40
codegen_flags: <defaults>
</compile_context>

<pallas_src>
import functools

import jax
import jax.numpy as jnp
from jax.experimental import pallas as pl
from jax.experimental.pallas import tpu as pltpu


def _round_up(v, m):
    return (v + m - 1) // m * m


def _round_down(v, m):
    return (v // m) * m


def _cdiv(a, b):
    return -(-a // b)


def _vmem_capacity_bytes():
    """Physical per-core VMEM; conservative (v7x, 64 MiB) fallback on failure."""
    try:
        return int(pltpu.get_tpu_info().vmem_capacity_bytes)
    except Exception:
        return 64 * 1024 * 1024


_TARGET_TILE_BYTES = 1 << 20  # >= ~1 MiB of input per buffered tile (amortize step cost)
_MIN_ROW_BLOCKS = 4           # so the "parallel" row axis can shard across v7x's 2 TCs


def _gap_kernel_single(x_ref, o_ref, *, inv_hw):
    """Whole H*W row reduced in one step: grid = (row_blocks,), no scratch.

    The block's lane extent equals the full H*W array dim, so Mosaic tracks the
    logical extent and jnp.sum ignores physical lane padding.
    """
    x = x_ref[...].astype(jnp.float32)
    o_ref[...] = (jnp.sum(x, axis=1, keepdims=True) * inv_hw).astype(o_ref.dtype)


def _gap_kernel_multi(x_ref, o_ref, acc_ref, *, hw, tile_c, mask_cols, inv_hw):
    """Split reduction: grid = (row_blocks, col_blocks); H*W axis is last.

    x_ref:   (TILE_R, TILE_C) input tile (original dtype, upcast in-kernel)
    o_ref:   (TILE_R, 1)      output tile (written once, on the last k step)
    acc_ref: (TILE_R, 1) f32  running sum, persists across the reduction axis
    """
    k = pl.program_id(1)
    last = pl.num_programs(1) - 1

    @pl.when(k == 0)
    def _():
        acc_ref[...] = jnp.zeros_like(acc_ref)

    x = x_ref[...].astype(jnp.float32)

    if mask_cols:
        # Only the final column block can run past H*W; every other step stays
        # a plain lane-sum so the mask's VALU ops stay off the streaming path.
        @pl.when(k != last)
        def _():
            acc_ref[...] += jnp.sum(x, axis=1, keepdims=True)

        @pl.when(k == last)
        def _():
            col = k * tile_c + jax.lax.broadcasted_iota(jnp.int32, x.shape, 1)
            xm = jnp.where(col < hw, x, 0.0)
            acc_ref[...] += jnp.sum(xm, axis=1, keepdims=True)
    else:
        acc_ref[...] += jnp.sum(x, axis=1, keepdims=True)

    @pl.when(k == last)
    def _():
        # Fold the 1/(H*W) scale in as a compile-time constant (sum, not mean,
        # so a split/padded reduction axis never skews the divisor).
        o_ref[...] = (acc_ref[...] * inv_hw).astype(o_ref.dtype)


def _choose_tiles(n_rows, hw, itemsize):
    """Return (tile_r, tile_c, vmem_limit). tile_c == hw selects the
    single-step (no-scratch) kernel path."""
    vmem_cap = _vmem_capacity_bytes()
    # Bytes reserved for the double-buffered input tiles: ~35% of physical
    # VMEM (~22 MiB on v7x, ~45 MiB on v5e/v6e), leaving headroom for output
    # buffers and Mosaic's internal scratch.
    input_budget = min(int(vmem_cap * 0.35), 48 * 1024 * 1024)
    vmem_limit = min(input_budget + (8 << 20), int(vmem_cap * 0.75))

    padded_hw = _round_up(hw, 128)       # lanes the DMA actually moves
    row_bytes = padded_hw * itemsize
    rows_fit = input_budget // (2 * row_bytes)

    if rows_fit >= min(8, n_rows):
        # Whole H*W row fits: single reduction step, tile only the row axis.
        if n_rows <= 8:
            tile_r = n_rows  # full-extent row block
        else:
            rows_up = _round_up(n_rows, 8)
            # Amortization floor: >= ~1 MiB of input per tile.
            amort_rows = _round_up(_cdiv(_TARGET_TILE_BYTES, row_bytes), 8)
            # Megacore cap: keep >= _MIN_ROW_BLOCKS blocks when rows allow it.
            mc_rows = _round_up(_cdiv(n_rows, _MIN_ROW_BLOCKS), 8)
            tile_r = min(
                max(8, _round_down(rows_fit, 8)),
                rows_up,
                max(amort_rows, mc_rows),
            )
        return tile_r, hw, vmem_limit

    # Very large spatial extent: also tile the reduction axis.
    tile_r = min(8, n_rows)
    tile_c = max(128, _round_down(input_budget // (2 * tile_r * itemsize), 128))
    tile_c = min(tile_c, padded_hw)
    return tile_r, tile_c, vmem_limit


def global_avg_pool(x):
    """x: (N, C, H, W) -> (N, C, 1, 1), matching F.avg_pool2d(x, x.shape[2:])."""
    n, c, h, w = x.shape
    rows, hw = n * c, h * w
    # Keep the input dtype through the DMA (HBM bytes are the whole cost);
    # upcast to f32 only inside the kernel for accumulation.
    x2d = x.reshape(rows, hw)
    itemsize = jnp.dtype(x.dtype).itemsize
    inv_hw = 1.0 / float(hw)

    tile_r, tile_c, vmem_limit = _choose_tiles(rows, hw, itemsize)

    cost = pl.CostEstimate(
        flops=rows * hw,
        transcendentals=0,
        bytes_accessed=rows * hw * itemsize + rows * itemsize,
    )

    if tile_c == hw:
        # Single-step path: no scratch, 1-D parallel grid.
        kernel = functools.partial(_gap_kernel_single, inv_hw=inv_hw)
        out2d = pl.pallas_call(
            kernel,
            out_shape=jax.ShapeDtypeStruct((rows, 1), x.dtype),
            grid=(pl.cdiv(rows, tile_r),),
            in_specs=[pl.BlockSpec((tile_r, hw), lambda i: (i, 0))],
            out_specs=pl.BlockSpec((tile_r, 1), lambda i: (i, 0)),
            compiler_params=pltpu.CompilerParams(
                dimension_semantics=("parallel",),
                vmem_limit_bytes=vmem_limit,
            ),
            cost_estimate=cost,
        )(x2d)
    else:
        mask_cols = (hw % tile_c) != 0
        kernel = functools.partial(
            _gap_kernel_multi, hw=hw, tile_c=tile_c, mask_cols=mask_cols, inv_hw=inv_hw
        )
        out2d = pl.pallas_call(
            kernel,
            out_shape=jax.ShapeDtypeStruct((rows, 1), x.dtype),
            grid=(pl.cdiv(rows, tile_r), pl.cdiv(hw, tile_c)),
            in_specs=[pl.BlockSpec((tile_r, tile_c), lambda i, k: (i, k))],
            out_specs=pl.BlockSpec((tile_r, 1), lambda i, k: (i, 0)),
            scratch_shapes=[pltpu.VMEM((tile_r, 1), jnp.float32)],
            compiler_params=pltpu.CompilerParams(
                # Rows are independent -> "parallel"; the H*W reduction axis
                # must stay "arbitrary" and come last.
                dimension_semantics=("parallel", "arbitrary"),
                vmem_limit_bytes=vmem_limit,
            ),
            cost_estimate=cost,
        )(x2d)

    return out2d.reshape(n, c, 1, 1)


if __name__ == "__main__":
    key = jax.random.PRNGKey(0)

    # Primary test: small NCHW input.
    x = jax.random.normal(key, (2, 4, 16, 16), dtype=jnp.float32)
    out = global_avg_pool(x)
    jax.block_until_ready(out)
    ref = jnp.mean(x, axis=(2, 3), keepdims=True)
    assert out.shape == (2, 4, 1, 1), out.shape
    assert jnp.allclose(out, ref, atol=1e-5, rtol=1e-5), float(
        jnp.max(jnp.abs(out - ref))
    )

    # Shape-edge test: H*W not a multiple of 128 and N*C not a multiple of 8
    # (exercises lane padding and partial row blocks).
    x2 = jax.random.normal(jax.random.PRNGKey(1), (2, 3, 7, 7), dtype=jnp.float32)
    out2 = global_avg_pool(x2)
    jax.block_until_ready(out2)
    ref2 = jnp.mean(x2, axis=(2, 3), keepdims=True)
    assert out2.shape == (2, 3, 1, 1), out2.shape
    assert jnp.allclose(out2, ref2, atol=1e-5, rtol=1e-5), float(
        jnp.max(jnp.abs(out2 - ref2))
    )

    print("KERNEL_OK")
</pallas_src>

<mosaic_0001>
module attributes {stable_mosaic.version = 11 : i64} {
  func.func @_gap_kernel_single(%arg0: i32, %arg1: memref<8x256xf32, #tpu.memory_space<vmem>>, %arg2: memref<8x1xf32, #tpu.memory_space<vmem>>) attributes {dimension_semantics = [#tpu.dimension_semantics<parallel>], iteration_bounds = array<i64: 1>, scalar_prefetch = 0 : i64, scratch_operands = 0 : i64, tpu.core_type = #tpu.core_type<tc>, window_params = [{transform_indices = @transform_0, window_bounds = array<i64: 8, 256>}, {transform_indices = @transform_1, window_bounds = array<i64: 8, 1>}]} {
    %c0 = arith.constant 0 : index
    %c0_0 = arith.constant 0 : index
    %0 = vector.load %arg1[%c0, %c0_0] : memref<8x256xf32, #tpu.memory_space<vmem>>, vector<8x256xf32>
    %cst = arith.constant dense<0.000000e+00> : vector<8xf32>
    %1 = vector.multi_reduction <add>, %0, %cst [1] : vector<8x256xf32> to vector<8xf32>
    %2 = vector.shape_cast %1 : vector<8xf32> to vector<8x1xf32>
    %cst_1 = arith.constant 3.906250e-03 : f32
    %3 = vector.broadcast %cst_1 : f32 to vector<8x1xf32>
    %4 = arith.mulf %2, %3 : vector<8x1xf32>
    %c0_2 = arith.constant 0 : index
    %c0_3 = arith.constant 0 : index
    %5 = vector.load %arg2[%c0_2, %c0_3] : memref<8x1xf32, #tpu.memory_space<vmem>>, vector<8x1xf32>
    tpu.vector_store %arg2[%c0_2, %c0_3], %4 {strides = array<i32>} : memref<8x1xf32, #tpu.memory_space<vmem>>, vector<8x1xf32>,
    return
  }
  func.func @transform_0(%arg0: i32) -> (i32, i32) {
    %c0_i32 = arith.constant 0 : i32
    %c0_i32_0 = arith.constant 0 : i32
    return %arg0, %c0_i32 : i32, i32
  }
  func.func @transform_1(%arg0: i32) -> (i32, i32) {
    %c0_i32 = arith.constant 0 : i32
    %c0_i32_0 = arith.constant 0 : i32
    return %arg0, %c0_i32 : i32, i32
  }
}

</mosaic_0001>

<bundles_post_ra>
// kernel: tpu_custom_call.1
= control target key start
LH: loop header
LB: loop body
LE: loop exit
PB: predicated region body
PF: predicated region fallthrough
CT: control target
= control target key end

     0   :  { %6 = vsyncpa [#allocation3], 0  ;;  %s62_s9 = smov [#allocation2]   ;;  %s79_s0 = inlined_call_operand.hbm [shape: f32[8,256], index: 0, kind: input, shape index: {}]   ;;  %s80_s1 = inlined_call_operand.vmem [shape: f32[8,1], index: 1, kind: output, shape index: {}]  }
   0x1   :  { %s12_s8 = sshll.u32 %s79_s0, 4  ;;  %s14_s10 = sshll.u32 %s62_s9, 4  ;;  %s13_s8 = int_to_ptr.hbm [resolvable:$true] %s12_s8  ;;  %s15_s10 = int_to_ptr.vmem [resolvable:$true] %s14_s10 }
   0x2   :  { %17 = dma.hbm_to_vmem [thread:$0]  %s13_s8, 256, %s15_s10, [#allocation3]  }
   0x3   :  { %60 = dma.done.wait [#allocation3], 256  }
   0x4   :  { %61 = vsyncadd [#allocation3], 4294967040  ;;  %v22_v0 = vld [vmem:[#allocation2] sm:$0xff]  ;;  %v23_v1 = vld [vmem:[#allocation2 + $0x8] sm:$0xff]  ;;  %vm28_vm0 = vcmask 7168  }
   0x5   :  { %v24_v2 = vadd.f32 %v23_v1, %v22_v0 }
   0x7   :  { %25 = vadd.xlane.f32.xlu0 %v24_v2 }
  0x7a   :  { %v26_v3 = vpop.xlane.xlu0 %25 }
  0x7b   :  { %v27_v4 = vmul.f32 0.00390625, %v26_v3 }
  0x7d   :  { %29 = vst.msk [vmem:[%s80_s1] sm:$0xff] %vm28_vm0, %v27_v4 }
  0x7e   :  { %34 = vsyncpa [#allocation3], 1 }

</bundles_post_ra>
